<compile_context>
chip_gen: v7x
topology: tpu7x:2x2x1
jax: 0.10.0
libtpu: 0.0.40
codegen_flags: <defaults>
</compile_context>

<pallas_src>
import functools

import jax
import jax.numpy as jnp
from jax.experimental import pallas as pl
from jax.experimental.pallas import tpu as pltpu


def _reg_l1_kernel(ind_ref, mask_ref, target_ref, feat_ref, out_ref, pred_acc,
                   *, Kp, C, tHW):
    h = pl.program_id(1)

    @pl.when(h == 0)
    def _():
        pred_acc[...] = jnp.zeros_like(pred_acc)

    feat = feat_ref[0]                                    # (C, tHW), HW on lanes

    # Hoisted tile offset: shift the (1, Kp) indices, not the (tHW, Kp) iota.
    idx_local = ind_ref[0] - h * tHW                      # (1, Kp) int32
    hw_iota = jax.lax.broadcasted_iota(jnp.int32, (tHW, Kp), 0)
    onehot_t = (hw_iota == idx_local).astype(feat.dtype)  # (tHW, Kp)

    # Exact f32 gather-by-matmul on the MXU (MXU is far from the bottleneck,
    # so HIGHEST precision is free and guarantees pred == gathered feat).
    pred_acc[...] += jnp.dot(feat, onehot_t,
                             preferred_element_type=jnp.float32,
                             precision=jax.lax.Precision.HIGHEST)  # (C, Kp)

    @pl.when(h == pl.num_programs(1) - 1)
    def _():
        m = mask_ref[0].astype(jnp.float32)               # (1, Kp)
        tgt = target_ref[0].astype(jnp.float32)           # (C, Kp)
        diff = jnp.abs(pred_acc[...] - tgt) * m           # (C, Kp), mask >= 0
        # Reduce over C only (sublanes); Kp stays lane-dense in the output.
        out_ref[...] = jnp.sum(diff, axis=0, keepdims=True).reshape(1, 1, Kp)


def _physical_vmem_bytes():
    """Per-core VMEM capacity; conservative 64 MiB (v7x) fallback."""
    try:
        info = pltpu.get_tpu_info()
        v = getattr(info, "vmem_capacity_bytes", None)
        if v:
            return int(v)
    except Exception:
        pass
    return 64 << 20


def _hw_tile_footprint_bytes(t, C, Kp):
    feat_db = 2 * C * t * 4          # double-buffered feat tile
    onehot = 3 * t * Kp * 4          # iota + compare + f32 one-hot temporaries
    return feat_db + onehot


def _pick_hw_tile(HW, C, Kp, budget_bytes):
    """Largest legal HW tile whose in-flight VMEM footprint fits the budget."""
    if _hw_tile_footprint_bytes(HW, C, Kp) <= budget_bytes or HW % 128 != 0:
        # Whole spatial extent per step (grid collapses to (B, 1)), or HW is not
        # tileable to a lane multiple: take the full extent.
        return HW
    n = HW // 128
    for d in range(n, 0, -1):        # largest multiple-of-128 divisor first
        if n % d == 0 and _hw_tile_footprint_bytes(d * 128, C, Kp) <= budget_bytes:
            return d * 128
    return 128


def reg_l1_loss(output, mask, ind, target):
    """output: (B, C, H, W), mask: (B, K), ind: (B, K) int, target: (B, K, C)."""
    B, C, H, W = output.shape
    K = ind.shape[1]
    HW = H * W

    # Pad K up to a lane multiple (padded slots carry mask = 0, so they
    # contribute nothing to the numerator; the denominator uses the raw mask).
    Kp = max(128, ((K + 127) // 128) * 128)
    padk = Kp - K

    feat = output.reshape(B, C, HW)                       # metadata-only reshape
    ind_p = jnp.pad(ind.astype(jnp.int32), ((0, 0), (0, padk)))
    mask_f = mask.astype(jnp.float32)
    mask_p = jnp.pad(mask_f, ((0, 0), (0, padk)))
    tgt_p = jnp.pad(target.astype(jnp.float32), ((0, 0), (0, padk), (0, 0)))

    ind3 = ind_p.reshape(B, 1, Kp)                        # K on lanes
    mask3 = mask_p.reshape(B, 1, Kp)                      # K on lanes
    tgt_t = jnp.transpose(tgt_p, (0, 2, 1))               # (B, C, Kp) (tiny)

    # Generation-aware tile sizing and scoped-VMEM limit (v7x: 64 MiB physical,
    # v5e/v6e: 128 MiB; v5e's 16 MiB default scoped limit needs raising).
    phys_vmem = _physical_vmem_bytes()
    tile_budget = int(phys_vmem * 0.45)
    tHW = _pick_hw_tile(HW, C, Kp, tile_budget)
    n_hw = HW // tHW

    needed = (_hw_tile_footprint_bytes(tHW, C, Kp)        # feat + one-hot temps
              + 2 * C * Kp * 4                            # target double buffer
              + C * Kp * 4                                # accumulator scratch
              + 8 * Kp * 4)                               # ind/mask/out buffers
    vmem_limit = int(min(phys_vmem * 0.70, max(32 << 20, needed * 2)))

    kernel = functools.partial(_reg_l1_kernel, Kp=Kp, C=C, tHW=tHW)

    cost = pl.CostEstimate(
        flops=2 * B * C * HW * Kp,
        transcendentals=0,
        bytes_accessed=4 * (B * C * HW + B * C * Kp + 3 * B * Kp),
    )

    partials = pl.pallas_call(
        kernel,
        out_shape=jax.ShapeDtypeStruct((B, 1, Kp), jnp.float32),
        grid_spec=pltpu.PrefetchScalarGridSpec(
            num_scalar_prefetch=0,
            grid=(B, n_hw),
            in_specs=[
                pl.BlockSpec((1, 1, Kp), lambda b, h: (b, 0, 0)),    # ind
                pl.BlockSpec((1, 1, Kp), lambda b, h: (b, 0, 0)),    # mask
                pl.BlockSpec((1, C, Kp), lambda b, h: (b, 0, 0)),    # target^T
                pl.BlockSpec((1, C, tHW), lambda b, h: (b, 0, h)),   # feat (NCHW)
            ],
            out_specs=pl.BlockSpec((1, 1, Kp), lambda b, h: (b, 0, 0)),
            scratch_shapes=[pltpu.VMEM((C, Kp), jnp.float32)],
        ),
        compiler_params=pltpu.CompilerParams(
            dimension_semantics=("parallel", "arbitrary"),
            vmem_limit_bytes=vmem_limit),
        cost_estimate=cost,
    )(ind3, mask3, tgt_t, feat)

    num = jnp.sum(partials)
    # Denominator = sum of the mask *expanded* over C, computed on the raw
    # (unpadded) mask — padding never enters the denominator.
    den = jnp.sum(mask_f) * jnp.float32(C) + jnp.float32(1e-4)
    return num / den


def reg_l1_loss_ref(output, mask, ind, target):
    """Pure-JAX reference mirroring the PyTorch module."""
    B, C, H, W = output.shape
    feat = jnp.transpose(output, (0, 2, 3, 1)).reshape(B, H * W, C)
    pred = jnp.take_along_axis(feat, ind[:, :, None].astype(jnp.int32), axis=1)
    m = jnp.broadcast_to(mask[:, :, None].astype(jnp.float32), pred.shape)
    loss = jnp.sum(jnp.abs(pred * m - target * m))
    return loss / (jnp.sum(m) + 1e-4)


if __name__ == "__main__":
    B, C, H, W, K = 2, 4, 16, 16, 8

    key = jax.random.PRNGKey(0)
    k_out, k_ind, k_mask, k_tgt = jax.random.split(key, 4)

    output = jax.random.normal(k_out, (B, C, H, W), dtype=jnp.float32)
    ind = jax.random.randint(k_ind, (B, K), 0, H * W, dtype=jnp.int32)
    mask = (jax.random.uniform(k_mask, (B, K)) < 0.7).astype(jnp.float32)
    target = jax.random.normal(k_tgt, (B, K, C), dtype=jnp.float32)

    loss = jax.block_until_ready(reg_l1_loss(output, mask, ind, target))
    loss_ref = jax.block_until_ready(reg_l1_loss_ref(output, mask, ind, target))

    assert jnp.allclose(loss, loss_ref, rtol=1e-5, atol=1e-6), (loss, loss_ref)
    print("KERNEL_OK")
</pallas_src>

<mosaic_0001>
module attributes {stable_mosaic.version = 11 : i64} {
  func.func @_reg_l1_kernel(%arg0: i32, %arg1: i32, %arg2: memref<1x1x128xi32, #tpu.memory_space<vmem>>, %arg3: memref<1x1x128xf32, #tpu.memory_space<vmem>>, %arg4: memref<1x4x128xf32, #tpu.memory_space<vmem>>, %arg5: memref<1x4x256xf32, #tpu.memory_space<vmem>>, %arg6: memref<1x1x128xf32, #tpu.memory_space<vmem>>, %arg7: memref<4x128xf32, #tpu.memory_space<vmem>>) attributes {dimension_semantics = [#tpu.dimension_semantics<parallel>, #tpu.dimension_semantics<arbitrary>], iteration_bounds = array<i64: 2, 1>, scalar_prefetch = 0 : i64, scratch_operands = 1 : i64, tpu.core_type = #tpu.core_type<tc>, window_params = [{transform_indices = @transform_0, window_bounds = array<i64: 1, 1, 128>}, {transform_indices = @transform_1, window_bounds = array<i64: 1, 1, 128>}, {transform_indices = @transform_2, window_bounds = array<i64: 1, 4, 128>}, {transform_indices = @transform_3, window_bounds = array<i64: 1, 4, 256>}, {transform_indices = @transform_4, window_bounds = array<i64: 1, 1, 128>}]} {
    %c0_i32 = arith.constant 0 : i32
    %0 = arith.cmpi eq, %arg1, %c0_i32 : i32
    %1 = arith.extui %0 : i1 to i32
    %c0_i32_0 = arith.constant 0 : i32
    %2 = arith.cmpi ne, %1, %c0_i32_0 : i32
    scf.if %2 {
      %cst_12 = arith.constant 0.000000e+00 : f32
      %22 = vector.broadcast %cst_12 : f32 to vector<4x128xf32>
      %c0_13 = arith.constant 0 : index
      %c0_14 = arith.constant 0 : index
      %23 = vector.load %arg7[%c0_13, %c0_14] : memref<4x128xf32, #tpu.memory_space<vmem>>, vector<4x128xf32>
      tpu.vector_store %arg7[%c0_13, %c0_14], %22 {strides = array<i32>} : memref<4x128xf32, #tpu.memory_space<vmem>>, vector<4x128xf32>,
    } else {
    }
    %c0 = arith.constant 0 : index
    %c0_1 = arith.constant 0 : index
    %c0_2 = arith.constant 0 : index
    %3 = vector.load %arg5[%c0, %c0_1, %c0_2] : memref<1x4x256xf32, #tpu.memory_space<vmem>>, vector<1x4x256xf32>
    %4 = vector.shape_cast %3 : vector<1x4x256xf32> to vector<4x256xf32>
    %c0_3 = arith.constant 0 : index
    %c0_4 = arith.constant 0 : index
    %c0_5 = arith.constant 0 : index
    %5 = vector.load %arg2[%c0_3, %c0_4, %c0_5] : memref<1x1x128xi32, #tpu.memory_space<vmem>>, vector<1x1x128xi32>
    %6 = vector.shape_cast %5 : vector<1x1x128xi32> to vector<1x128xi32>
    %c256_i32 = arith.constant 256 : i32
    %7 = arith.muli %arg1, %c256_i32 : i32
    %8 = vector.broadcast %7 : i32 to vector<1x128xi32>
    %9 = arith.subi %6, %8 : vector<1x128xi32>
    %10 = tpu.iota {dimensions = array<i32: 0>} : vector<256x128xi32>
    %11 = vector.broadcast %9 : vector<1x128xi32> to vector<256x128xi32>
    %12 = arith.cmpi eq, %10, %11 : vector<256x128xi32>
    %13 = arith.extui %12 : vector<256x128xi1> to vector<256x128xi32>
    %14 = arith.sitofp %13 : vector<256x128xi32> to vector<256x128xf32>
    %c0_6 = arith.constant 0 : index
    %c0_7 = arith.constant 0 : index
    %15 = vector.load %arg7[%c0_6, %c0_7] : memref<4x128xf32, #tpu.memory_space<vmem>>, vector<4x128xf32>
    %cst = arith.constant dense<0.000000e+00> : vector<4x128xf32>
    %16 = tpu.matmul %4, %14, %cst {dimension_numbers = #tpu.dot_dimension_numbers<[1], [0], [0], [1], [0, 0, 1, 1], [], []>, precision = #tpu.contract_precision<fp32>} : vector<4x256xf32>, vector<256x128xf32>, vector<4x128xf32> -> vector<4x128xf32>
    %17 = arith.addf %15, %16 : vector<4x128xf32>
    %c0_8 = arith.constant 0 : index
    %c0_9 = arith.constant 0 : index
    %18 = vector.load %arg7[%c0_8, %c0_9] : memref<4x128xf32, #tpu.memory_space<vmem>>, vector<4x128xf32>
    tpu.vector_store %arg7[%c0_8, %c0_9], %17 {strides = array<i32>} : memref<4x128xf32, #tpu.memory_space<vmem>>, vector<4x128xf32>,
    %c0_i32_10 = arith.constant 0 : i32
    %19 = arith.cmpi eq, %arg1, %c0_i32_10 : i32
    %20 = arith.extui %19 : i1 to i32
    %c0_i32_11 = arith.constant 0 : i32
    %21 = arith.cmpi ne, %20, %c0_i32_11 : i32
    scf.if %21 {
      %c0_12 = arith.constant 0 : index
      %c0_13 = arith.constant 0 : index
      %c0_14 = arith.constant 0 : index
      %22 = vector.load %arg3[%c0_12, %c0_13, %c0_14] : memref<1x1x128xf32, #tpu.memory_space<vmem>>, vector<1x1x128xf32>
      %23 = vector.shape_cast %22 : vector<1x1x128xf32> to vector<1x128xf32>
      %c0_15 = arith.constant 0 : index
      %c0_16 = arith.constant 0 : index
      %c0_17 = arith.constant 0 : index
      %24 = vector.load %arg4[%c0_15, %c0_16, %c0_17] : memref<1x4x128xf32, #tpu.memory_space<vmem>>, vector<1x4x128xf32>
      %25 = vector.shape_cast %24 : vector<1x4x128xf32> to vector<4x128xf32>
      %c0_18 = arith.constant 0 : index
      %c0_19 = arith.constant 0 : index
      %26 = vector.load %arg7[%c0_18, %c0_19] : memref<4x128xf32, #tpu.memory_space<vmem>>, vector<4x128xf32>
      %27 = arith.subf %26, %25 : vector<4x128xf32>
      %28 = math.absf %27 : vector<4x128xf32>
      %29 = vector.broadcast %23 : vector<1x128xf32> to vector<4x128xf32>
      %30 = arith.mulf %28, %29 : vector<4x128xf32>
      %cst_20 = arith.constant dense<0.000000e+00> : vector<128xf32>
      %31 = vector.multi_reduction <add>, %30, %cst_20 [0] : vector<4x128xf32> to vector<128xf32>
      %32 = vector.shape_cast %31 : vector<128xf32> to vector<1x128xf32>
      %33 = vector.shape_cast %32 : vector<1x128xf32> to vector<1x1x128xf32>
      %c0_21 = arith.constant 0 : index
      %c0_22 = arith.constant 0 : index
      %c0_23 = arith.constant 0 : index
      %34 = vector.load %arg6[%c0_21, %c0_22, %c0_23] : memref<1x1x128xf32, #tpu.memory_space<vmem>>, vector<1x1x128xf32>
      tpu.vector_store %arg6[%c0_21, %c0_22, %c0_23], %33 {strides = array<i32>} : memref<1x1x128xf32, #tpu.memory_space<vmem>>, vector<1x1x128xf32>,
    } else {
    }
    return
  }
  func.func @transform_0(%arg0: i32, %arg1: i32) -> (i32, i32, i32) {
    %c0_i32 = arith.constant 0 : i32
    %c0_i32_0 = arith.constant 0 : i32
    %c0_i32_1 = arith.constant 0 : i32
    return %arg0, %c0_i32, %c0_i32_0 : i32, i32, i32
  }
  func.func @transform_1(%arg0: i32, %arg1: i32) -> (i32, i32, i32) {
    %c0_i32 = arith.constant 0 : i32
    %c0_i32_0 = arith.constant 0 : i32
    %c0_i32_1 = arith.constant 0 : i32
    return %arg0, %c0_i32, %c0_i32_0 : i32, i32, i32
  }
  func.func @transform_2(%arg0: i32, %arg1: i32) -> (i32, i32, i32) {
    %c0_i32 = arith.constant 0 : i32
    %c0_i32_0 = arith.constant 0 : i32
    %c0_i32_1 = arith.constant 0 : i32
    return %arg0, %c0_i32, %c0_i32_0 : i32, i32, i32
  }
  func.func @transform_3(%arg0: i32, %arg1: i32) -> (i32, i32, i32) {
    %c0_i32 = arith.constant 0 : i32
    %c0_i32_0 = arith.constant 0 : i32
    return %arg0, %c0_i32, %arg1 : i32, i32, i32
  }
  func.func @transform_4(%arg0: i32, %arg1: i32) -> (i32, i32, i32) {
    %c0_i32 = arith.constant 0 : i32
    %c0_i32_0 = arith.constant 0 : i32
    %c0_i32_1 = arith.constant 0 : i32
    return %arg0, %c0_i32, %c0_i32_0 : i32, i32, i32
  }
}

</mosaic_0001>

<bundles_post_ra>
// kernel: tpu_custom_call.1
= control target key start
LH: loop header
LB: loop body
LE: loop exit
PB: predicated region body
PF: predicated region fallthrough
CT: control target
= control target key end

     0   :  { %s3236_s0 = inlined_call_operand.hbm [shape: s32[2,1,128], index: 0, kind: input, shape index: {}]   ;;  %s3237_s1 = inlined_call_operand.vmem [shape: f32[2,1,128], index: 1, kind: input, shape index: {}]   ;;  %s3238_s2 = inlined_call_operand.hbm [shape: f32[2,4,128], index: 2, kind: input, shape index: {}]   ;;  %s3239_s3 = inlined_call_operand.hbm [shape: f32[2,4,256], index: 3, kind: input, shape index: {}]   ;;  %s3240_s4 = inlined_call_operand.hbm [shape: f32[2,1,128], index: 4, kind: output, shape index: {}]  }
   0x1   :  { %3298 = sst [smem:[#allocation20_spill]] %s3238_s2 }
   0x2   :  { %9 = vsyncpa [#allocation4], 0 }
   0x3   :  { %11 = vsyncpa [#allocation4 + $0x1], 0 }
   0x4   :  { %12 = vsyncpa [#allocation7], 0 }
   0x5   :  { %14 = vsyncpa [#allocation7 + $0x1], 0 }
   0x6   :  { %15 = vsyncpa [#allocation5], 0 }
   0x7   :  { %17 = vsyncpa [#allocation5 + $0x1], 0  ;;  %s2319_s15 = smov 0   ;;  %s2321_s16 = smov 0  }
   0x8   :  { %s2323_s17 = smov 0   ;;  %s2325_s18 = smov 0  }
   0x9   :  { %s2327_s19 = smov 0   ;;  %s2329_s20 = smov 0  }
   0xa LB: > { %s2350_s21 = sadd.s32 4294967295, %s2286_s20   ;;  %s1487_s22 = sadd.s32 4294967294, %s2286_s20   ;;  %s2286_s20 = sphi %s2329_s20, %s23_s20   ;;  %s2282_s19 = sphi %s2327_s19, %s3404_s19   ;;  %s2278_s18 = sphi %s2325_s18, %s3403_s18   ;;  %s2274_s17 = sphi %s2323_s17, %s3402_s17   ;;  %s2270_s16 = sphi %s2321_s16, %s3401_s16   ;;  %s2266_s15 = sphi %s2319_s15, %s3400_s15  }
   0xb   : > { %s35_s23 = sadd.s32 1, %s2282_s19  ;;  %s42_s24 = sadd.s32 1, %s2274_s17 }
   0xc   : > { %p37_p0 = scmp.ge.s32.totalorder %s35_s23, 2  ;;  %p49_p1 = scmp.ne.s32.totalorder %s2274_s17, %s2270_s16 }
   0xd   : > { %p50_p2 = scmp.eq.s32.totalorder %s2286_s20, 0  ;;  %p55_p3 = scmp.ne.s32.totalorder %s2270_s16, %s2266_s15 }
   0xe   : > { %s3406_s23 = smov (%p37_p0, %s35_s23), 0  ;;  %p56_p5 = scmp.eq.s32.totalorder %s2350_s21, 0 }
   0xf   : > { %3299 = sst [smem:[#allocation13_spill]] %s3406_s23  ;;  %p2362_p4 = por %p50_p2, %p49_p1 }
  0x10   : > { %s39_s26 = ssub.s32 %s2282_s19, %s3406_s23  ;;  %p159_p6 = scmp.eq.s32.totalorder %s2350_s21, 1 }
  0x11   : > { %p40_p7 = scmp.eq.s32.totalorder %s39_s26, 0  ;;  %p2370_p8 = por %p56_p5, %p55_p3 }
  0x12   : > { %p2374_p9 = por %p159_p6, %p49_p1  ;;  %p165_p10 = scmp.eq.s32.totalorder %s1487_s22, 1 }
  0x13   : > { %s3301_s27 = scalar_select %p2370_p8, 1, 0 }
  0x14   : > { %s3302_s28 = scalar_select %p2374_p9, 1, 0 }
  0x15   : > { %s2379_s29 = scalar_select %p40_p7, %s2274_s17, %s42_s24  }
  0x16   : > { %p2381_p11 = por %p165_p10, %p55_p3  ;;  %p2057_p13 = scmp.lt.s32.totalorder %s2286_s20, 2 }
  0x17   : > { %s2388_s5 = sand.u32 1, %s2274_s17   ;;  %s208_s6 = sand.u32 1, %s2286_s20  }
  0x18   : > { %s3303_s30 = scalar_select %p2381_p11, 1, 0 }
  0x19   : > { %s1491_s7 = sshll.u32 %s2388_s5, 2  ;;  %p2394_p0 = pnand %p2057_p13, %p2362_p4 }
  0x1a   : > { %s1492_s9 = sshll.u32 %s2282_s19, 6  ;;  %s3305_s2 = sld [smem:[#allocation20_spill]] }
  0x1b   : > { %s3304_s8 = scalar_select %p2394_p0, 1, 0 }
  0x1c   : > { %s212_s13 = scalar_lea.vmem [#allocation6], %s1491_s7  ;;  %s2408_s22 = scalar_lea.sflag [#allocation7], %s208_s6 }
  0x1d   : > { %s219_s14 = sshll.u32 %s212_s13, 4  ;;  %p2414_p4 = pneg %p2394_p0  ;;  %s2405_s14 = int_to_ptr.vmem [resolvable:$true] %s219_s14 }
  0x20   : > { %s2402_s12 = scalar_lea.hbm %s3305_s2, %s1492_s9  ;;  %s2115_s9 = scalar_lea.hbm %s3305_s2, 128 }
  0x21   : > { %s2110_s24 = scalar_lea.hbm %s2402_s12, 64  ;;  %p2116_p7 = scmp.lt.u32.totalorder %s2402_s12, %s3305_s2 }
  0x22   : > { %p2111_p3 = scmp.ne.s32.totalorder %s2402_s12, %s2110_s24  ;;  %p2117_p10 = scmp.lt.u32.totalorder %s2115_s9, %s2110_s24 }
  0x23   : > { %p2119_p12 = scmp.lt.u32.totalorder %s2110_s24, %s2402_s12 }
  0x24   : > { %p2113_p5 = pnand %p2414_p4, %p2111_p3  ;;  %p2118_p13 = por %p2117_p10, %p2116_p7 }
  0x26   : > { %p2114_p6 = pneg %p2113_p5  ;;  %p2120_p1 = por %p2119_p12, %p2118_p13 }
  0x28   : > { %p2121_p2 = pnand %p2120_p1, %p2114_p6 }
  0x2a   : > { %2124 = shalt.err (!%p2121_p2)
}
  0x2b   : > { %s2125_s6 = scalar_lea.vmem %s2405_s14, 64  ;;  %s2288_s13 = smov [#allocation6]  }
  0x2c   : > { %p2126_p3 = scmp.ne.s32.totalorder %s2405_s14, %s2125_s6  ;;  %s2130_s26 = sshll.u32 %s2288_s13, 4  ;;  %s2131_s26 = int_to_ptr.vmem [resolvable:$false] %s2130_s26 }
  0x2d   : > { %s2132_s7 = scalar_lea.vmem %s2131_s26, 128  ;;  %p2133_p9 = scmp.lt.s32.totalorder %s2405_s14, %s2131_s26 }
  0x2e   : > { %p2128_p5 = pnand %p2126_p3, %p2414_p4  ;;  %p2134_p8 = scmp.lt.s32.totalorder %s2132_s7, %s2125_s6 }
  0x30   : > { %p2129_p11 = pneg %p2128_p5  ;;  %p2135_p7 = por %p2134_p8, %p2133_p9 }
  0x32   : > { %p2136_p10 = pnand %p2135_p7, %p2129_p11 }
  0x34   : > { %2139 = shalt.err (!%p2136_p10)
}
  0x35   : > { %2049 = dma.hbm_to_vmem [thread:$0]  (!%p2394_p0), %s2402_s12, 64, %s2405_s14, %s2408_s22  }
  0x36   : > { %p3307_p12 = scmp.lt.s32.totalorder %s2286_s20, 3  ;;  %p3308_p1 = scmp.ge.s32.totalorder %s2286_s20, 1 }
  0x37   : > { %s1490_s9 = sshll.u32 %s2282_s19, 4  ;;  %s188_s13 = scalar_lea.vmem [#allocation3], %s2388_s5 }
  0x38   : > { %p2442_p2 = pnand %p3308_p1, %p3307_p12  ;;  %s2450_s6 = scalar_lea.hbm %s3236_s0, %s1490_s9 }
  0x39   : > { %s195_s26 = sshll.u32 %s188_s13, 4  ;;  %s1493_s12 = sshll.u32 %s2388_s5, 3  ;;  %s2453_s26 = int_to_ptr.vmem [resolvable:$true] %s195_s26 }
  0x3a   : > { %s3309_s24 = scalar_select %p2442_p2, 1, 0 }
  0x3b   : > { %s186_s14 = scalar_lea.sflag [#allocation4], %s2388_s5  ;;  %s2140_s7 = scalar_lea.hbm %s2450_s6, 16 }
  0x3c   : > { %p2141_p8 = scmp.ne.s32.totalorder %s2450_s6, %s2140_s7  ;;  %s2145_s9 = scalar_lea.hbm %s3236_s0, 32 }
  0x3d   : > { %p2146_p6 = scmp.lt.u32.totalorder %s2450_s6, %s3236_s0  ;;  %p2147_p13 = scmp.lt.u32.totalorder %s2145_s9, %s2140_s7 }
  0x3e   : > { %p2143_p9 = pnand %p2141_p8, %p2414_p4  ;;  %p2149_p5 = scmp.lt.u32.totalorder %s2140_s7, %s2450_s6 }
  0x3f   : > { %p2148_p3 = por %p2147_p13, %p2146_p6 }
  0x40   : > { %p2144_p11 = pneg %p2143_p9 }
  0x41   : > { %p2150_p7 = por %p2149_p5, %p2148_p3 }
  0x43   : > { %p2151_p10 = pnand %p2150_p7, %p2144_p11 }
  0x45   : > { %2154 = shalt.err (!%p2151_p10)
}
  0x46   : > { %s2155_s13 = scalar_lea.vmem %s2453_s26, 16  ;;  %s2289_s2 = smov [#allocation3]  }
  0x47   : > { %p2156_p12 = scmp.ne.s32.totalorder %s2453_s26, %s2155_s13  ;;  %s2160_s23 = sshll.u32 %s2289_s2, 4  ;;  %s2161_s23 = int_to_ptr.vmem [resolvable:$false] %s2160_s23 }
  0x48   : > { %s2162_s10 = scalar_lea.vmem %s2161_s23, 32  ;;  %p2163_p9 = scmp.lt.s32.totalorder %s2453_s26, %s2161_s23 }
  0x49   : > { %p2158_p1 = pnand %p2156_p12, %p2414_p4  ;;  %p2164_p2 = scmp.lt.s32.totalorder %s2162_s10, %s2155_s13 }
  0x4b   : > { %p2159_p8 = pneg %p2158_p1  ;;  %p2165_p6 = por %p2164_p2, %p2163_p9 }
  0x4d   : > { %p2166_p13 = pnand %p2165_p6, %p2159_p8 }
  0x4f   : > { %2169 = shalt.err (!%p2166_p13)
}
  0x50   : > { %2046 = dma.hbm_to_vmem [thread:$0]  (!%p2394_p0), %s2450_s6, 16, %s2453_s26, %s186_s14  }
  0x51   : > { %s1632_s7 = sshll.u32 %s2282_s19, 7  ;;  %s230_s13 = scalar_lea.vmem [#allocation8], %s1493_s12 }
  0x52   : > { %s2482_s2 = scalar_lea.hbm %s3239_s3, %s1632_s7  ;;  %s240_s23 = sshll.u32 %s230_s13, 4  ;;  %s241_s23 = int_to_ptr.vmem [resolvable:$true] %s240_s23 }
  0x53   : > { %s2170_s10 = scalar_lea.hbm %s2482_s2, 128  ;;  %s2175_s14 = scalar_lea.hbm %s3239_s3, 256 }
  0x54   : > { %p2171_p2 = scmp.ne.s32.totalorder %s2482_s2, %s2170_s10  ;;  %p2176_p5 = scmp.lt.u32.totalorder %s2482_s2, %s3239_s3 }
  0x55   : > { %p2177_p7 = scmp.lt.u32.totalorder %s2175_s14, %s2170_s10  ;;  %p2179_p12 = scmp.lt.u32.totalorder %s2170_s10, %s2482_s2 }
  0x56   : > { %p2173_p11 = pnand %p2171_p2, %p2414_p4 }
  0x57   : > { %p2178_p10 = por %p2177_p7, %p2176_p5 }
  0x58   : > { %p2174_p3 = pneg %p2173_p11 }
  0x59   : > { %p2180_p1 = por %p2179_p12, %p2178_p10 }
  0x5b   : > { %p2181_p8 = pnand %p2180_p1, %p2174_p3 }
  0x5d   : > { %2184 = shalt.err (!%p2181_p8)
}
  0x5e   : > { %s2185_s5 = scalar_lea.vmem %s241_s23, 128  ;;  %s2290_s12 = smov [#allocation8]  }
  0x5f   : > { %p2186_p9 = scmp.ne.s32.totalorder %s241_s23, %s2185_s5  ;;  %s2190_s11 = sshll.u32 %s2290_s12, 4  ;;  %s2191_s11 = int_to_ptr.vmem [resolvable:$false] %s2190_s11 }
  0x60   : > { %s2192_s13 = scalar_lea.vmem %s2191_s11, 256  ;;  %p2193_p2 = scmp.lt.s32.totalorder %s241_s23, %s2191_s11 }
  0x61   : > { %p2188_p6 = pnand %p2186_p9, %p2414_p4  ;;  %p2194_p11 = scmp.lt.s32.totalorder %s2192_s13, %s2185_s5 }
  0x63   : > { %p2189_p13 = pneg %p2188_p6  ;;  %p2195_p0 = por %p2194_p11, %p2193_p2 }
  0x65   : > { %p2196_p5 = pnand %p2195_p0, %p2189_p13 }
  0x67   : > { %2199 = shalt.err (!%p2196_p5)
}
  0x68   : > { %p3310_p7 = scmp.ne.s32.totalorder %s3304_s8, 0  ;;  %p3311_p3 = scmp.ne.s32.totalorder %s3309_s24, 0 }
  0x6a   : > { %2052 = dma.hbm_to_vmem [thread:$0]  (!%p3310_p7), %s2482_s2, 128, %s241_s23, %s2408_s22  }
  0x6b   : > { %249 = sbr.rel (%p3311_p3) target bundleno = 521 (0x209), region = 36 }
  0x72   : > { %s2507_s25 = sand.u32 1, %s2270_s16   ;;  %p3312_p4 = scmp.ne.s32.totalorder %s3301_s27, 0 }
  0x73   : > { %s252_s10 = scalar_lea.sflag [#allocation4], %s2507_s25  ;;  %s254_s6 = scalar_lea.vmem [#allocation3], %s2507_s25 }
  0x74   : > { %2253 = dma.done.wait (%p3312_p4), %s252_s10, 16  }
  0x75   : > { %2255 = vsyncadd (%p3312_p4), %s252_s10, 4294967280  ;;  %s259_s8 = sand.u32 1, %s2350_s21   ;;  %s1497_s22 = sshll.u32 %s2507_s25, 2 }
  0x76   : > { %s260_s24 = scalar_lea.sflag [#allocation7], %s259_s8  ;;  %s2517_s2 = scalar_lea.vmem [#allocation6], %s1497_s22 }
  0x77   : > { %2257 = dma.done.wait (%p3312_p4), %s260_s24, 192  }
  0x78   : > { %2259 = vsyncadd (%p3312_p4), %s260_s24, 4294967104  ;;  %v322_v0 = vlaneseq  ;;  %v2291_v1 = vmov 0.0   ;;  %v2537_v14 = vld [vmem:[%s254_s6] ss:$0 sm:$0xff]  ;;  %v3268_v24 = vmov 1.0|1.0  }
  0x79   : > { %316 = vst [vmem:[#allocation2] sm:$0xf] %v2291_v1  ;;  %s1498_s21 = sshll.u32 %s2507_s25, 3  ;;  %p308_p0 = scmp.lt.s32.totalorder %s2278_s18, 1 }
  0x7a   : > { %v2524_v2 = vshrl.u32 %v322_v0, 7  ;;  %s272_s27 = scalar_lea.vmem [#allocation8], %s1498_s21  ;;  %s1629_s7 = sshll.u32 %s2278_s18, 4 }
  0x7b   : > { %s309_s23 = scalar_select %p308_p0, %s2278_s18, 1 }
  0x7c   : > { %v339_v3 = vadd.s32 128, %v2524_v2  ;;  %v340_v4 = vadd.s32 136, %v2524_v2  ;;  %v324_v5 = vadd.s32 8, %v2524_v2  ;;  %v341_v6 = vadd.s32 144, %v2524_v2  ;;  %s307_s5 = scalar_lea.vmem [#allocation9], %s2507_s25  ;;  %s3187_s10 = scalar_lea.hbm %s3240_s4, %s1629_s7 }
  0x7d   : > { %v342_v7 = vadd.s32 152, %v2524_v2  ;;  %v325_v8 = vadd.s32 16, %v2524_v2  ;;  %v326_v9 = vadd.s32 24, %v2524_v2  ;;  %v343_v10 = vadd.s32 160, %v2524_v2  ;;  %s310_s9 = scalar_lea.vmem %s3237_s1, %s309_s23  ;;  %s1360_s12 = sshll.u32 %s307_s5, 4  ;;  %s3189_s12 = int_to_ptr.vmem [resolvable:$true] %s1360_s12 }
  0x7e   : > { %v344_v11 = vadd.s32 168, %v2524_v2  ;;  %v327_v12 = vadd.s32 32, %v2524_v2  ;;  %v328_v13 = vadd.s32 40, %v2524_v2  ;;  %v2540_v15 = vadd.s32 176, %v2524_v2  ;;  %s1348_s6 = scalar_lea.sflag [#allocation5], %s2507_s25  ;;  %s2200_s8 = scalar_lea.vmem %s3189_s12, 16 }
  0x7f   : > { %v2543_v16 = vadd.s32 184, %v2524_v2  ;;  %v2546_v17 = vadd.s32 48, %v2524_v2  ;;  %v2549_v18 = vadd.s32 56, %v2524_v2  ;;  %vm375_vm0 = vcmp.eq.s32.totalorder %v339_v3, %v2537_v14  ;;  %p2201_p10 = scmp.ne.s32.totalorder %s3189_s12, %s2200_s8  ;;  %p3396_p12 = scmp.ne.s32.totalorder %s3302_s28, 0 }
  0x80   : > { %vm376_vm1 = vcmp.eq.s32.totalorder %v340_v4, %v2537_v14  ;;  %vm359_vm2 = vcmp.eq.s32.totalorder %v2524_v2, %v2537_v14  ;;  %vm360_vm3 = vcmp.eq.s32.totalorder %v324_v5, %v2537_v14  ;;  %v1516_v19 = vsel %vm375_vm0, 1.0, %v2291_v1  ;;  %s2293_s18 = smov [#allocation9]  }
  0x81   : > { %v1517_v20 = vsel %vm376_vm1, 1.0, %v2291_v1  ;;  %vm2558_vm4 = vmpackc.low %vm376_vm1, %vm375_vm0  ;;  %v1500_v22 = vsel %vm359_vm2, 1.0, %v2291_v1  ;;  %v2564_v23 = vadd.s32 192, %v2524_v2  ;;  %v2569_v25 = vsub.f32 %v1516_v19, %v1516_v19  ;;  %p2202_p1 = pnand %p2201_p10, %p3396_p12  ;;  %s2204_s22 = sshll.u32 %s2293_s18, 4  ;;  %s2205_s22 = int_to_ptr.vmem [resolvable:$false] %s2204_s22 }
  0x82   : > { %1844 = vmatprep.subr.msk.bf16.mxu0 %vm2558_vm4, %v3268_v24  ;;  %v2571_v26 = vsub.f32 %v1517_v20, %v1517_v20  ;;  %v1501_v27 = vsel %vm360_vm3, 1.0, %v2291_v1  ;;  %vm2574_vm5 = vmpackc.low %vm360_vm3, %vm359_vm2  ;;  %v2578_v29 = vsub.f32 %v1500_v22, %v1500_v22  ;;  %vm377_vm6 = vcmp.eq.s32.totalorder %v341_v6, %v2537_v14  ;;  %s2206_s24 = scalar_lea.vmem %s2205_s22, 32  ;;  %p2207_p9 = scmp.lt.s32.totalorder %s3189_s12, %s2205_s22 }
  0x83   : > { %1846 = vmatpush3.bf16.msk.msra.mxu0 %vm2574_vm5, %v3268_v24  ;;  %vm378_vm7 = vcmp.eq.s32.totalorder %v342_v7, %v2537_v14  ;;  %vm361_vm8 = vcmp.eq.s32.totalorder %v325_v8, %v2537_v14  ;;  %vm362_vm9 = vcmp.eq.s32.totalorder %v326_v9, %v2537_v14  ;;  %v1518_v30 = vsel %vm377_vm6, 1.0, %v2291_v1  ;;  %p2203_p8 = pneg %p2202_p1  ;;  %p2208_p6 = scmp.lt.s32.totalorder %s2206_s24, %s2200_s8 }
  0x84   : > { %v1519_v31 = vsel %vm378_vm7, 1.0, %v2291_v1  ;;  %vm2589_vm10 = vmpackc.low %vm378_vm7, %vm377_vm6  ;;  %v1502_v33 = vsel %vm361_vm8, 1.0, %v2291_v1  ;;  %v1503_v34 = vsel %vm362_vm9, 1.0, %v2291_v1  ;;  %v2595_v35 = vsub.f32 %v1501_v27, %v1501_v27 }
  0x85   : > { %1848 = vmatprep.subr.msk.bf16.mxu0 %vm2589_vm10, %v3268_v24  ;;  %v2600_v36 = vsub.f32 %v1518_v30, %v1518_v30  ;;  %v2602_v37 = vsub.f32 %v1519_v31, %v1519_v31  ;;  %vm2604_vm11 = vmpackc.low %vm362_vm9, %vm361_vm8  ;;  %v2608_v39 = vsub.f32 %v1502_v33, %v1502_v33  ;;  %vm379_vm12 = vcmp.eq.s32.totalorder %v343_v10, %v2537_v14  ;;  %p2209_p13 = por %p2208_p6, %p2207_p9 }
  0x86   : > { %vm380_vm13 = vcmp.eq.s32.totalorder %v344_v11, %v2537_v14  ;;  %vm363_vm14 = vcmp.eq.s32.totalorder %v327_v12, %v2537_v14  ;;  %vm364_vm15 = vcmp.eq.s32.totalorder %v328_v13, %v2537_v14  ;;  %v2617_v40 = vsub.f32 %v1503_v34, %v1503_v34 }
  0x87   : > { %1850 = vmatpush3.bf16.msk.msra.mxu0 %vm2604_vm11, %v3268_v24  ;;  %v1520_v41 = vsel %vm379_vm12, 1.0, %v2291_v1  ;;  %v1521_v42 = vsel %vm380_vm13, 1.0, %v2291_v1  ;;  %vm2621_vm0 = vmpackc.low %vm380_vm13, %vm379_vm12  ;;  %v1504_v44 = vsel %vm363_vm14, 1.0, %v2291_v1  ;;  %v1505_v47 = vsel %vm364_vm15, 1.0, %v2291_v1  ;;  %p2210_p2 = pnand %p2209_p13, %p2203_p8 }
  0x88   : > { %1852 = vmatprep.subr.msk.bf16.mxu0 %vm2621_vm0, %v3268_v24  ;;  %v2629_v45 = vsub.f32 %v1520_v41, %v1520_v41  ;;  %v2631_v46 = vsub.f32 %v1521_v42, %v1521_v42  ;;  %vm2634_vm1 = vmpackc.low %vm364_vm15, %vm363_vm14  ;;  %v2638_v49 = vsub.f32 %v1504_v44, %v1504_v44  ;;  %v3273_v50 = vand.u32 4294901760, %v2569_v25 }
  0x89   : > { %v3272_v51 = vand.u32 4294901760, %v2571_v26  ;;  %v3271_v52 = vand.u32 4294901760, %v2578_v29  ;;  %v3261_v53 = vand.u32 4294901760, %v2595_v35  ;;  %vm381_vm2 = vcmp.eq.s32.totalorder %v2540_v15, %v2537_v14 }
  0x8a   : > { %vm382_vm3 = vcmp.eq.s32.totalorder %v2543_v16, %v2537_v14  ;;  %vm365_vm6 = vcmp.eq.s32.totalorder %v2546_v17, %v2537_v14  ;;  %vm366_vm7 = vcmp.eq.s32.totalorder %v2549_v18, %v2537_v14  ;;  %v687_v54 = vsub.f32 %v2569_v25, %v3273_v50 }
  0x8b   : > { %1854 = vmatpush3.bf16.msk.msra.mxu0 %vm2634_vm1, %v3268_v24  ;;  %v694_v55 = vsub.f32 %v2571_v26, %v3272_v51  ;;  %v575_v56 = vsub.f32 %v2578_v29, %v3271_v52  ;;  %v582_v57 = vsub.f32 %v2595_v35, %v3261_v53  ;;  %vm2667_vm8 = vmpackc.low %vm382_vm3, %vm381_vm2  ;;  %v2671_v59 = vsub.f32 %v1505_v47, %v1505_v47 }
  0x8c   : > { %v1522_v60 = vsel %vm381_vm2, 1.0, %v2291_v1  ;;  %v1523_v61 = vsel %vm382_vm3, 1.0, %v2291_v1  ;;  %1856 = vmatprep.subr.msk.bf16.mxu0 %vm2667_vm8, %v3268_v24  ;;  %v1506_v62 = vsel %vm365_vm6, 1.0, %v2291_v1  ;;  %vm2682_vm9 = vmpackc.low %vm366_vm7, %vm365_vm6  ;;  %v688_v0 = vand.u32 4294901760, %v687_v54 }
  0x8d   : > { %v695_v3 = vand.u32 4294901760, %v694_v55  ;;  %v576_v4 = vand.u32 4294901760, %v575_v56  ;;  %v583_v5 = vand.u32 4294901760, %v582_v57  ;;  %v2686_v6 = vsub.f32 %v1522_v60, %v1522_v60 }
  0x8e   : > { %v2688_v7 = vsub.f32 %v1523_v61, %v1523_v61  ;;  %v1507_v8 = vsel %vm366_vm7, 1.0, %v2291_v1  ;;  %v2694_v9 = vsub.f32 %v1506_v62, %v1506_v62  ;;  %v3260_v12 = vand.u32 4294901760, %v2600_v36 }
  0x8f   : > { %v1875_v10 = vpack.c.bf16 %v695_v3, %v688_v0  ;;  %v1877_v11 = vpack.c.bf16 %v583_v5, %v576_v4  ;;  %1858 = vmatpush3.bf16.msk.msra.mxu0 %vm2682_vm9, %v3268_v24  ;;  %v3258_v13 = vand.u32 4294901760, %v2602_v37  ;;  %v3257_v15 = vand.u32 4294901760, %v2608_v39 }
  0x90   : > { %v3255_v16 = vand.u32 4294901760, %v2617_v40  ;;  %v348_v17 = vadd.s32 200, %v2524_v2  ;;  %vm383_vm12 = vcmp.eq.s32.totalorder %v2564_v23, %v2537_v14  ;;  %v701_v18 = vsub.f32 %v2600_v36, %v3260_v12 }
  0x91   : > { %1876 = vmatprep.subr.bf16.mxu1 %v1875_v10  ;;  %v708_v19 = vsub.f32 %v2602_v37, %v3258_v13  ;;  %v1524_v20 = vsel %vm383_vm12, 1.0, %v2291_v1  ;;  %v331_v22 = vadd.s32 64, %v2524_v2  ;;  %v2714_v27 = vsub.f32 %v1507_v8, %v1507_v8 }
  0x92   : > { %1878 = vmatpush3.bf16.msra.mxu1 %v1877_v11  ;;  %v589_v23 = vsub.f32 %v2608_v39, %v3257_v15  ;;  %v596_v30 = vsub.f32 %v2617_v40, %v3255_v16  ;;  %vm384_vm13 = vcmp.eq.s32.totalorder %v348_v17, %v2537_v14  ;;  %v702_v31 = vand.u32 4294901760, %v701_v18 }
  0x93   : > { %v709_v33 = vand.u32 4294901760, %v708_v19  ;;  %v1525_v34 = vsel %vm384_vm13, 1.0, %v2291_v1  ;;  %vm2724_vm14 = vmpackc.low %vm384_vm13, %vm383_vm12  ;;  %v332_v42 = vadd.s32 72, %v2524_v2  ;;  %v2732_v54 = vsub.f32 %v1524_v20, %v1524_v20 }
  0x94   : > { %v590_v44 = vand.u32 4294901760, %v589_v23  ;;  %v597_v47 = vand.u32 4294901760, %v596_v30  ;;  %1860 = vmatprep.subr.msk.bf16.mxu0 %vm2724_vm14, %v3268_v24  ;;  %vm367_vm15 = vcmp.eq.s32.totalorder %v331_v22, %v2537_v14  ;;  %v3251_v57 = vand.u32 4294901760, %v2629_v45 }
  0x95   : > { %v1879_v55 = vpack.c.bf16 %v709_v33, %v702_v31  ;;  %vm368_vm2 = vcmp.eq.s32.totalorder %v332_v42, %v2537_v14  ;;  %v1508_v56 = vsel %vm367_vm15, 1.0, %v2291_v1  ;;  %v2738_v61 = vsub.f32 %v1525_v34, %v1525_v34 }
  0x96   : > { %v1881_v60 = vpack.c.bf16 %v597_v47, %v590_v44  ;;  %v1509_v62 = vsel %vm368_vm2, 1.0, %v2291_v1  ;;  %vm2741_vm3 = vmpackc.low %vm368_vm2, %vm367_vm15  ;;  %v3249_v3 = vand.u32 4294901760, %v2631_v46  ;;  %v2749_v4 = vsub.f32 %v1508_v56, %v1508_v56 }
  0x97   : > { %1880 = vmatprep.subr.bf16.mxu1 %v1879_v55  ;;  %1862 = vmatpush3.bf16.msk.msra.mxu0 %vm2741_vm3, %v3268_v24  ;;  %v715_v5 = vsub.f32 %v2629_v45, %v3251_v57  ;;  %v3247_v8 = vand.u32 4294901760, %v2638_v49  ;;  %v3246_v10 = vand.u32 4294901760, %v2671_v59  ;;  %v349_v17 = vadd.s32 208, %v2524_v2 }
  0x98   : > { %1882 = vmatpush3.bf16.msra.mxu1 %v1881_v60  ;;  %v722_v11 = vsub.f32 %v2631_v46, %v3249_v3  ;;  %v350_v18 = vadd.s32 216, %v2524_v2  ;;  %v333_v19 = vadd.s32 80, %v2524_v2  ;;  %v334_v30 = vadd.s32 88, %v2524_v2 }
  0x99   : > { %v716_v20 = vand.u32 4294901760, %v715_v5  ;;  %v603_v22 = vsub.f32 %v2638_v49, %v3247_v8  ;;  %v610_v23 = vsub.f32 %v2671_v59, %v3246_v10  ;;  %vm385_vm6 = vcmp.eq.s32.totalorder %v349_v17, %v2537_v14 }
  0x9a   : > { %v723_v31 = vand.u32 4294901760, %v722_v11  ;;  %vm386_vm7 = vcmp.eq.s32.totalorder %v350_v18, %v2537_v14  ;;  %vm369_vm12 = vcmp.eq.s32.totalorder %v333_v19, %v2537_v14  ;;  %v1526_v42 = vsel %vm385_vm6, 1.0, %v2291_v1 }
  0x9b   : > { %v604_v33 = vand.u32 4294901760, %v603_v22  ;;  %v611_v34 = vand.u32 4294901760, %v610_v23  ;;  %v1527_v44 = vsel %vm386_vm7, 1.0, %v2291_v1  ;;  %vm2774_vm13 = vmpackc.low %vm386_vm7, %vm385_vm6  ;;  %v2778_v55 = vsub.f32 %v1509_v62, %v1509_v62 }
  0x9c   : > { %v1883_v56 = vpack.c.bf16 %v723_v31, %v716_v20  ;;  %1864 = vmatprep.subr.msk.bf16.mxu0 %vm2774_vm13, %v3268_v24  ;;  %v2783_v60 = vsub.f32 %v1526_v42, %v1526_v42  ;;  %vm370_vm15 = vcmp.eq.s32.totalorder %v334_v30, %v2537_v14  ;;  %v2786_v11 = vsub.f32 %v1527_v44, %v1527_v44 }
  0x9d   : > { %v1885_v5 = vpack.c.bf16 %v611_v34, %v604_v33  ;;  %v1510_v17 = vsel %vm369_vm12, 1.0, %v2291_v1  ;;  %vm2789_vm2 = vmpackc.low %vm370_vm15, %vm369_vm12  ;;  %v3335_v18 = vmov 0  ;;  %v3245_v62 = vand.u32 4294901760, %v2686_v6 }
  0x9e   : > { %v3336_v18 = vsel %vm2789_vm2, 4294967295, %v3335_v18  ;;  %1884 = vmatprep.subr.bf16.mxu1 %v1883_v56  ;;  %v1511_v19 = vsel %vm370_vm15, 1.0, %v2291_v1  ;;  %1866 = vmatpush3.bf16.msk.msra.mxu0 %vm2789_vm2, %v3268_v24  ;;  %v2798_v20 = vsub.f32 %v1510_v17, %v1510_v17  ;;  %v3248_v22 = vand.u32 4294901760, %v2688_v7 }
  0x9f   : > { %v3250_v23 = vand.u32 4294901760, %v2694_v9  ;;  %1886 = vmatpush3.bf16.msra.mxu1 %v1885_v5  ;;  %v729_v30 = vsub.f32 %v2686_v6, %v3245_v62  ;;  %v3254_v31 = vand.u32 4294901760, %v2714_v27  ;;  %v351_v33 = vadd.s32 224, %v2524_v2 }
  0xa0   : > { %v352_v34 = vadd.s32 232, %v2524_v2  ;;  %v736_v42 = vsub.f32 %v2688_v7, %v3248_v22  ;;  %v335_v56 = vadd.s32 96, %v2524_v2  ;;  %v336_v5 = vadd.s32 104, %v2524_v2 }
  0xa1   : > { %v617_v44 = vsub.f32 %v2694_v9, %v3250_v23  ;;  %v730_v17 = vand.u32 4294901760, %v729_v30  ;;  %v624_v62 = vsub.f32 %v2714_v27, %v3254_v31  ;;  %vm387_vm6 = vcmp.eq.s32.totalorder %v351_v33, %v2537_v14 }
  0xa2   : > { %vm388_vm7 = vcmp.eq.s32.totalorder %v352_v34, %v2537_v14  ;;  %v737_v10 = vand.u32 4294901760, %v736_v42  ;;  %v1528_v22 = vsel %vm387_vm6, 1.0, %v2291_v1  ;;  %v3337_v23 = vmov 0 }
  0xa3   : > { %v618_v8 = vand.u32 4294901760, %v617_v44  ;;  %v1529_v3 = vsel %vm388_vm7, 1.0, %v2291_v1  ;;  %vm2823_vm12 = vmpackc.low %vm388_vm7, %vm387_vm6  ;;  %v2827_v30 = vsub.f32 %v1511_v19, %v1511_v19  ;;  %v625_v57 = vand.u32 4294901760, %v624_v62 }
  0xa4   : > { %v3338_v23 = vsel %vm2823_vm12, 4294967295, %v3337_v23  ;;  %1868 = vmatprep.subr.msk.bf16.mxu0 %vm2823_vm12, %v3268_v24  ;;  %v2832_v33 = vsub.f32 %v1528_v22, %v1528_v22  ;;  %vm371_vm15 = vcmp.eq.s32.totalorder %v335_v56, %v2537_v14  ;;  %v1887_v34 = vpack.c.bf16 %v737_v10, %v730_v17 }
  0xa5   : > { %3339 = vst [vmem:[#allocation14_spill] sm:$0xff] %v3338_v23  ;;  %vm372_vm2 = vcmp.eq.s32.totalorder %v336_v5, %v2537_v14  ;;  %v1512_v42 = vsel %vm371_vm15, 1.0, %v2291_v1  ;;  %v3256_v44 = vand.u32 4294901760, %v2732_v54  ;;  %v1889_v31 = vpack.c.bf16 %v625_v57, %v618_v8 }
  0xa6   : > { %v2838_v16 = vsub.f32 %v1529_v3, %v1529_v3  ;;  %v1513_v62 = vsel %vm372_vm2, 1.0, %v2291_v1  ;;  %vm2841_vm6 = vmpackc.low %vm372_vm2, %vm371_vm15  ;;  %v3340_v19 = vmov 0  ;;  %v3259_v22 = vand.u32 4294901760, %v2738_v61  ;;  %1888 = vmatprep.subr.bf16.mxu1 %v1887_v34 }
  0xa7   : > { %v3341_v19 = vsel %vm2841_vm6, 4294967295, %v3340_v19  ;;  %1870 = vmatpush3.bf16.msk.msra.mxu0 %vm2841_vm6, %v3268_v24  ;;  %v2850_v10 = vsub.f32 %v1512_v42, %v1512_v42  ;;  %v743_v57 = vsub.f32 %v2732_v54, %v3256_v44  ;;  %v3264_v3 = vand.u32 4294901760, %v2749_v4  ;;  %1890 = vmatpush3.bf16.msra.mxu1 %v1889_v31 }
  0xa8   : > { %3342 = vst [vmem:[#allocation15_spill] sm:$0xff] %v3341_v19  ;;  %v3265_v8 = vand.u32 4294901760, %v2778_v55  ;;  %v750_v56 = vsub.f32 %v2738_v61, %v3259_v22  ;;  %v353_v5 = vadd.s32 240, %v2524_v2  ;;  %v354_v17 = vadd.s32 248, %v2524_v2 }
  0xa9   : > { %v337_v34 = vadd.s32 112, %v2524_v2  ;;  %v744_v42 = vand.u32 4294901760, %v743_v57  ;;  %v631_v44 = vsub.f32 %v2749_v4, %v3264_v3  ;;  %v338_v31 = vadd.s32 120, %v2524_v2 }
  0xaa   : > { %v638_v15 = vsub.f32 %v2778_v55, %v3265_v8  ;;  %v751_v13 = vand.u32 4294901760, %v750_v56  ;;  %vm389_vm2 = vcmp.eq.s32.totalorder %v353_v5, %v2537_v14  ;;  %vm390_vm7 = vcmp.eq.s32.totalorder %v354_v17, %v2537_v14 }
  0xab   : > { %v632_v22 = vand.u32 4294901760, %v631_v44  ;;  %v1530_v57 = vsel %vm389_vm2, 1.0, %v2291_v1  ;;  %v1531_v53 = vsel %vm390_vm7, 1.0, %v2291_v1  ;;  %vm2875_vm6 = vmpackc.low %vm390_vm7, %vm389_vm2  ;;  %v3343_v3 = vmov 0 }
  0xac   : > { %v639_v12 = vand.u32 4294901760, %v638_v15  ;;  %v3344_v3 = vsel %vm2875_vm6, 4294967295, %v3343_v3  ;;  %v2879_v8 = vsub.f32 %v1513_v62, %v1513_v62  ;;  %v1891_v2 = vpack.c.bf16 %v751_v13, %v744_v42  ;;  %1872 = vmatprep.subr.msk.bf16.mxu0 %vm2875_vm6, %v3268_v24  ;;  %v317_v15 = vld [vmem:[%s272_s27] sm:$0xff] }
  0xad   : > { %3345 = vst [vmem:[#allocation16_spill] sm:$0xff] %v3344_v3  ;;  %v2884_v56 = vsub.f32 %v1530_v57, %v1530_v57  ;;  %vm374_vm15 = vcmp.eq.s32.totalorder %v338_v31, %v2537_v14  ;;  %vm3346_vm2 = vcmp.eq.s32.totalorder %v337_v34, %v2537_v14  ;;  %v3348_v13 = vmov 0 }
  0xae   : > { %v1893_v44 = vpack.c.bf16 %v639_v12, %v632_v22  ;;  %v1514_v5 = vsel %vm3346_vm2, 1.0, %v2291_v1  ;;  %v1515_v17 = vsel %vm374_vm15, 1.0, %v2291_v1  ;;  %vm3347_vm7 = vmmov %vm3346_vm2  ;;  %v3270_v62 = vand.u32 4294901760, %v2783_v60  ;;  %1892 = vmatprep.subr.bf16.mxu1 %v1891_v2 }
  0xaf   : > { %vm2893_vm12 = vmpackc.low %vm374_vm15, %vm3347_vm7  ;;  %v2898_v42 = vsub.f32 %v1531_v53, %v1531_v53  ;;  %v2903_v12 = vsub.f32 %v1514_v5, %v1514_v5  ;;  %v3274_v22 = vand.u32 4294901760, %v2786_v11  ;;  %v3275_v1 = vand.u32 4294901760, %v2798_v20 }
  0xb0   : > { %v3349_v13 = vsel %vm2893_vm12, 4294967295, %v3348_v13  ;;  %1874 = vmatpush3.bf16.msk.msra.mxu0 %vm2893_vm12, %v3268_v24  ;;  %1894 = vmatpush3.bf16.msra.mxu1 %v1893_v44  ;;  %v757_v14 = vsub.f32 %v2783_v60, %v3270_v62  ;;  %v3280_v34 = vand.u32 4294901760, %v2827_v30  ;;  %v457_v31 = vcombine.high %v317_v15, %v317_v15 }
  0xb1   : > { %3350 = vst [vmem:[#allocation17_spill] sm:$0xff] %v3349_v13  ;;  %v2911_v53 = vand.u32 4294901760, %v317_v15  ;;  %v2913_v57 = vsub.f32 %v1515_v17, %v1515_v17  ;;  %v764_v2 = vsub.f32 %v2786_v11, %v3274_v22  ;;  %v645_v5 = vsub.f32 %v2798_v20, %v3275_v1 }
  0xb2   : > { %v1907_v44 = vpack.c.bf16 %v2571_v26, %v2569_v25  ;;  %v758_v24 = vand.u32 4294901760, %v757_v14  ;;  %v652_v62 = vsub.f32 %v2827_v30, %v3280_v34  ;;  %v2926_v52 = vand.u32 4294901760, %v457_v31 }
  0xb3   : > { %v2929_v17 = vsub.f32 %v317_v15, %v2911_v53  ;;  %v765_v51 = vand.u32 4294901760, %v764_v2  ;;  %v646_v50 = vand.u32 4294901760, %v645_v5  ;;  %v3283_v22 = vand.u32 4294901760, %v2832_v33 }
  0xb4   : > { %3351 = vst [vmem:[#allocation18_spill] sm:$0xff] %v2926_v52  ;;  %1908 = vmatprep.subr.bf16.mxu0 %v1907_v44  ;;  %v3284_v1 = vand.u32 4294901760, %v2838_v16  ;;  %v653_v13 = vand.u32 4294901760, %v652_v62  ;;  %v2934_v3 = vsub.f32 %v457_v31, %v2926_v52  ;;  %v3292_v34 = vand.u32 4294901760, %v2850_v10  ;;  %796 = vmatprep.mubr.f32.mxu1 %v2926_v52 }
  0xb5   : > { %3352 = vst [vmem:[#allocation19_spill] sm:$0xff] %v2929_v17  ;;  %v3289_v14 = vand.u32 4294901760, %v2929_v17  ;;  %v1895_v19 = vpack.c.bf16 %v765_v51, %v758_v24  ;;  %v771_v15 = vsub.f32 %v2832_v33, %v3283_v22  ;;  %v3293_v62 = vand.u32 4294901760, %v2879_v8 }
  0xb6   : > { %v778_v2 = vsub.f32 %v2838_v16, %v3284_v1  ;;  %v1897_v5 = vpack.c.bf16 %v653_v13, %v646_v50  ;;  %v557_v31 = vand.u32 4294901760, %v2934_v3  ;;  %v659_v24 = vsub.f32 %v2850_v10, %v3292_v34 }
  0xb7   : > { %v564_v44 = vsub.f32 %v2929_v17, %v3289_v14  ;;  %1896 = vmatprep.subr.bf16.mxu1 %v1895_v19  ;;  %v772_v51 = vand.u32 4294901760, %v771_v15  ;;  %v666_v1 = vsub.f32 %v2879_v8, %v3293_v62  ;;  %v3294_v17 = vand.u32 4294901760, %v2884_v56 }
  0xb8   : > { %v779_v22 = vand.u32 4294901760, %v778_v2  ;;  %1898 = vmatpush3.bf16.msra.mxu1 %v1897_v5  ;;  %v558_v50 = vsub.f32 %v2934_v3, %v557_v31  ;;  %v660_v52 = vand.u32 4294901760, %v659_v24  ;;  %v3296_v34 = vand.u32 4294901760, %v2898_v42 }
  0xb9   : > { %v565_v13 = vand.u32 4294901760, %v564_v44  ;;  %v667_v14 = vand.u32 4294901760, %v666_v1  ;;  %v1909_v15 = vpack.c.bf16 %v2595_v35, %v2578_v29  ;;  %v3295_v2 = vand.u32 4294901760, %v2903_v12 }
  0xba   : > { %v1899_v23 = vpack.c.bf16 %v779_v22, %v772_v51  ;;  %v559_v19 = vand.u32 4294901760, %v558_v50  ;;  %v3297_v5 = vand.u32 4294901760, %v2913_v57  ;;  %v1911_v44 = vpack.c.bf16 %v2602_v37, %v2600_v36 }
  0xbb   : > { %v1901_v62 = vpack.c.bf16 %v667_v14, %v660_v52  ;;  %v785_v22 = vsub.f32 %v2884_v56, %v3294_v17  ;;  %v792_v1 = vsub.f32 %v2898_v42, %v3296_v34  ;;  %v673_v24 = vsub.f32 %v2903_v12, %v3295_v2 }
  0xbc   : > { %1900 = vmatprep.subr.bf16.mxu1 %v1899_v23  ;;  %560 = vmatprep.mubr.f32.mxu0 %v559_v19  ;;  %v680_v52 = vsub.f32 %v2913_v57, %v3297_v5  ;;  %v1913_v51 = vpack.c.bf16 %v2617_v40, %v2608_v39  ;;  %v1915_v2 = vpack.c.bf16 %v2631_v46, %v2629_v45  ;;  %v3384_v21 = vand.u32 4294901760, %v2783_v60 }
  0xbd   : > { %566 = vmatmul.mubr.f32.vlgmr.msra.gmra.mrb[0].mxu0 %v565_v13  ;;  %1902 = vmatpush3.bf16.msra.mxu1 %v1901_v62  ;;  %v786_v23 = vand.u32 4294901760, %v785_v22  ;;  %v793_v14 = vand.u32 4294901760, %v792_v1  ;;  %v674_v50 = vand.u32 4294901760, %v673_v24  ;;  %v1917_v13 = vpack.c.bf16 %v2671_v59, %v2638_v49 }
  0xbe   : > { %1910 = vmatpush3.bf16.msra.mxu0 %v1909_v15  ;;  %v681_v17 = vand.u32 4294901760, %v680_v52  ;;  %933 = vmatprep.mubr.f32.mxu0 %v2934_v3  ;;  %v3353_v62 = vand.u32 4294901760, %v2569_v25  ;;  %v3354_v15 = vand.u32 4294901760, %v2571_v26  ;;  %v3355_v1 = vand.u32 4294901760, %v2578_v29  ;;  %v3375_v3 = vld [vmem:[#allocation14_spill] sm:$0xff] }
  0xbf   : > { %1912 = vmatprep.subr.bf16.mxu0 %v1911_v44  ;;  %v1903_v19 = vpack.c.bf16 %v793_v14, %v786_v23  ;;  %v3356_v24 = vand.u32 4294901760, %v2595_v35  ;;  %v3357_v44 = vand.u32 4294901760, %v2600_v36  ;;  %v3358_v23 = vand.u32 4294901760, %v2602_v37 }
  0xc0   : > { %v1905_v34 = vpack.c.bf16 %v681_v17, %v674_v50  ;;  %v1971_v22 = vpack.c.bf16 %v3354_v15, %v3353_v62  ;;  %v3359_v17 = vand.u32 4294901760, %v2608_v39  ;;  %v3360_v50 = vand.u32 4294901760, %v2617_v40 }
  0xc1   : > { %v1973_v52 = vpack.c.bf16 %v3356_v24, %v3355_v1  ;;  %1904 = vmatprep.subr.bf16.mxu1 %v1903_v19  ;;  %v1975_v14 = vpack.c.bf16 %v3358_v23, %v3357_v44  ;;  %v3361_v25 = vand.u32 4294901760, %v2629_v45  ;;  %v3362_v26 = vand.u32 4294901760, %v2631_v46 }
  0xc2   : > { %v1977_v5 = vpack.c.bf16 %v3360_v50, %v3359_v17  ;;  %v3363_v29 = vand.u32 4294901760, %v2638_v49  ;;  %v3364_v35 = vand.u32 4294901760, %v2671_v59  ;;  %1914 = vmatpush3.bf16.msra.mxu0 %v1913_v51  ;;  %1906 = vmatpush3.bf16.msra.mxu1 %v1905_v34  ;;  %v3365_v36 = vand.u32 4294901760, %v2686_v6  ;;  %v3381_v17 = vld [vmem:[#allocation18_spill] sm:$0xff] }
  0xc3   : > { %v1979_v62 = vpack.c.bf16 %v3362_v26, %v3361_v25  ;;  %v3366_v37 = vand.u32 4294901760, %v2688_v7  ;;  %v3367_v40 = vand.u32 4294901760, %v2694_v9  ;;  %v3368_v15 = vand.u32 4294901760, %v2714_v27  ;;  %1916 = vmatprep.subr.bf16.mxu0 %v1915_v2 }
  0xc4   : > { %v1981_v19 = vpack.c.bf16 %v3364_v35, %v3363_v29  ;;  %v3369_v46 = vand.u32 4294901760, %v2732_v54  ;;  %v3370_v1 = vand.u32 4294901760, %v2738_v61  ;;  %v3371_v59 = vmov 1.0|1.0  }
  0xc5   : > { %v1983_v39 = vpack.c.bf16 %v3366_v37, %v3365_v36  ;;  %v1985_v45 = vpack.c.bf16 %v3368_v15, %v3367_v40  ;;  %1940 = vmatprep.subr.msk.bf16.mxu1 %vm2558_vm4, %v3371_v59  ;;  %v1919_v34 = vpack.c.bf16 %v2688_v7, %v2686_v6  ;;  %v3372_v51 = vand.u32 4294901760, %v2749_v4  ;;  %798 = vmatmul.mubr.f32.vlgmr.msra.gmra.mrb[0].mxu1 %v2911_v53 }
  0xc6   : > { %v1987_v49 = vpack.c.bf16 %v3370_v1, %v3369_v46  ;;  %v3373_v24 = vand.u32 4294901760, %v2778_v55  ;;  %1918 = vmatpush3.bf16.msra.mxu0 %v1917_v13  ;;  %1942 = vmatpush3.bf16.msk.msra.mxu1 %vm2574_vm5, %v3371_v59  ;;  %v1921_v2 = vpack.c.bf16 %v2714_v27, %v2694_v9  ;;  %v1923_v6 = vpack.c.bf16 %v2738_v61, %v2732_v54  ;;  %v3378_v13 = vld [vmem:[#allocation15_spill] sm:$0xff]  ;;  %v455_v46 = vld [vmem:[#allocation2] sm:$0xf] }
  0xc7   : > { %1920 = vmatprep.subr.bf16.mxu0 %v1919_v34  ;;  %1944 = vmatprep.subr.msk.bf16.mxu1 %vm2589_vm10, %v3371_v59  ;;  %v1925_v7 = vpack.c.bf16 %v2778_v55, %v2749_v4  ;;  %v1927_v9 = vpack.c.bf16 %v2786_v11, %v2783_v60  ;;  %v1929_v27 = vpack.c.bf16 %v2827_v30, %v2798_v20  ;;  %v3385_v28 = vand.u32 4294901760, %v2786_v11 }
  0xc8   : > { %v1989_v44 = vpack.c.bf16 %v3373_v24, %v3372_v51  ;;  %1040 = vmatprep.mubr.f32.mxu1 %v557_v31  ;;  %v1931_v54 = vpack.c.bf16 %v2838_v16, %v2832_v33  ;;  %v1933_v61 = vpack.c.bf16 %v2879_v8, %v2850_v10  ;;  %v1935_v4 = vpack.c.bf16 %v2898_v42, %v2884_v56  ;;  %v3377_v31 = vld [vmem:[#allocation19_spill] sm:$0xff]  ;;  %v1628_v24 = vld [vmem:[%s310_s9] ss:$0 sm:$0xff] }
  0xc9   : > { %v1937_v55 = vpack.c.bf16 %v2913_v57, %v2903_v12  ;;  %vm3374_vm15 = vnez %v3336_v18  ;;  %vm3376_vm2 = vnez %v3375_v3  ;;  %vm3379_vm7 = vnez %v3378_v13 }
  0xca   : > { %1922 = vmatpush3.bf16.msra.mxu0 %v1921_v2  ;;  %1946 = vmatpush3.bf16.msk.msra.mxu1 %vm2604_vm11, %v3371_v59  ;;  %v3386_v32 = vand.u32 4294901760, %v2798_v20  ;;  %v3387_v38 = vand.u32 4294901760, %v2827_v30  ;;  %v3388_v43 = vand.u32 4294901760, %v2832_v33  ;;  %v3389_v60 = vand.u32 4294901760, %v2838_v16 }
  0xcb   : > { %1924 = vmatprep.subr.bf16.mxu0 %v1923_v6  ;;  %1948 = vmatprep.subr.msk.bf16.mxu1 %vm2621_vm0, %v3371_v59  ;;  %v3390_v48 = vand.u32 4294901760, %v2850_v10  ;;  %v3391_v20 = vand.u32 4294901760, %v2879_v8  ;;  %v3392_v58 = vand.u32 4294901760, %v2884_v56  ;;  %v3393_v16 = vand.u32 4294901760, %v2898_v42 }
  0xcc   : > { %v1995_v11 = vpack.c.bf16 %v3389_v60, %v3388_v43  ;;  %v3394_v63 = vand.u32 4294901760, %v2903_v12  ;;  %v3395_v10 = vand.u32 4294901760, %v2913_v57 }
  0xcd   : > { %v1997_v30 = vpack.c.bf16 %v3391_v20, %v3390_v48  ;;  %v1999_v33 = vpack.c.bf16 %v3393_v16, %v3392_v58 }
  0xce   : > { %1926 = vmatpush3.bf16.msra.mxu0 %v1925_v7  ;;  %1950 = vmatpush3.bf16.msk.msra.mxu1 %vm2634_vm1, %v3371_v59  ;;  %v2001_v8 = vpack.c.bf16 %v3395_v10, %v3394_v63 }
  0xcf   : > { %1928 = vmatprep.subr.bf16.mxu0 %v1927_v9  ;;  %1952 = vmatprep.subr.msk.bf16.mxu1 %vm2667_vm8, %v3371_v59 }
  0xd2   : > { %1930 = vmatpush3.bf16.msra.mxu0 %v1929_v27  ;;  %1954 = vmatpush3.bf16.msk.msra.mxu1 %vm2682_vm9, %v3371_v59 }
  0xd3   : > { %1932 = vmatprep.subr.bf16.mxu0 %v1931_v54  ;;  %1956 = vmatprep.subr.msk.bf16.mxu1 %vm2724_vm14, %v3371_v59 }
  0xd6   : > { %1934 = vmatpush3.bf16.msra.mxu0 %v1933_v61  ;;  %1958 = vmatpush3.bf16.msk.msra.mxu1 %vm2741_vm3, %v3371_v59 }
  0xd7   : > { %1936 = vmatprep.subr.bf16.mxu0 %v1935_v4  ;;  %1960 = vmatprep.subr.msk.bf16.mxu1 %vm2774_vm13, %v3371_v59 }
  0xda   : > { %1938 = vmatpush3.bf16.msra.mxu0 %v1937_v55  ;;  %1962 = vmatpush3.bf16.msk.msra.mxu1 %vm3374_vm15, %v3371_v59 }
  0xdb   : > { %1972 = vmatprep.subr.bf16.mxu0 %v1971_v22  ;;  %1964 = vmatprep.subr.msk.bf16.mxu1 %vm3376_vm2, %v3371_v59 }
  0xdd   : > { %936 = vmatmul.mubr.f32.vlgmr.msra.gmra.mrb[2].mxu0 %v3377_v31 }
  0xde   : > { %1974 = vmatpush3.bf16.msra.mxu0 %v1973_v52  ;;  %1966 = vmatpush3.bf16.msk.msra.mxu1 %vm3379_vm7, %v3371_v59  ;;  %v3383_v52 = vand.u32 4294901760, %v3377_v31 }
  0xdf   : > { %1976 = vmatprep.subr.bf16.mxu0 %v1975_v14  ;;  %1968 = vmatprep.subr.msk.bf16.mxu1 %vm2875_vm6, %v3371_v59  ;;  %v1993_v14 = vpack.c.bf16 %v3387_v38, %v3386_v32 }
  0xe0   : > { %1210 = vmatprep.mubr.f32.mxu0 %v3381_v17 }
  0xe2   : > { %1978 = vmatpush3.bf16.msra.mxu0 %v1977_v5  ;;  %1970 = vmatpush3.bf16.msk.msra.mxu1 %vm2893_vm12, %v3371_v59  ;;  %v1991_v5 = vpack.c.bf16 %v3385_v28, %v3384_v21 }
  0xe3   : > { %1980 = vmatprep.subr.bf16.mxu0 %v1979_v62  ;;  %2004 = vmatprep.subr.msk.bf16.mxu1 %vm2558_vm4, %v3371_v59  ;;  %vm1338_vm4 = vcmask 1043456  }
  0xe5   : > { %1044 = vmatmul.mubr.f32.vlgmr.msra.gmra.mrb[2].mxu1 %v3383_v52 }
  0xe6   : > { %1982 = vmatpush3.bf16.msra.mxu0 %v1981_v19  ;;  %2006 = vmatpush3.bf16.msk.msra.mxu1 %vm2574_vm5, %v3371_v59 }
  0xe7   : > { %1984 = vmatprep.subr.bf16.mxu0 %v1983_v39  ;;  %2008 = vmatprep.subr.msk.bf16.mxu1 %vm2589_vm10, %v3371_v59 }
  0xe8   : > { %1314 = vmatprep.mubr.f32.mxu1 %v3381_v17 }
  0xea   : > { %1986 = vmatpush3.bf16.msra.mxu0 %v1985_v45  ;;  %2010 = vmatpush3.bf16.msk.msra.mxu1 %vm2604_vm11, %v3371_v59 }
  0xeb   : > { %1988 = vmatprep.subr.bf16.mxu0 %v1987_v49  ;;  %2012 = vmatprep.subr.msk.bf16.mxu1 %vm2621_vm0, %v3371_v59 }
  0xee   : > { %1990 = vmatpush3.bf16.msra.mxu0 %v1989_v44  ;;  %2014 = vmatpush3.bf16.msk.msra.mxu1 %vm2634_vm1, %v3371_v59 }
  0xef   : > { %1992 = vmatprep.subr.bf16.mxu0 %v1991_v5  ;;  %2016 = vmatprep.subr.msk.bf16.mxu1 %vm2667_vm8, %v3371_v59 }
  0xf2   : > { %1994 = vmatpush3.bf16.msra.mxu0 %v1993_v14  ;;  %2018 = vmatpush3.bf16.msk.msra.mxu1 %vm2682_vm9, %v3371_v59 }
  0xf3   : > { %1996 = vmatprep.subr.bf16.mxu0 %v1995_v11  ;;  %2020 = vmatprep.subr.msk.bf16.mxu1 %vm2724_vm14, %v3371_v59 }
  0xf6   : > { %1998 = vmatpush3.bf16.msra.mxu0 %v1997_v30  ;;  %2022 = vmatpush3.bf16.msk.msra.mxu1 %vm2741_vm3, %v3371_v59 }
  0xf7   : > { %2000 = vmatprep.subr.bf16.mxu0 %v1999_v33  ;;  %2024 = vmatprep.subr.msk.bf16.mxu1 %vm2774_vm13, %v3371_v59 }
  0xfa   : > { %2002 = vmatpush3.bf16.msra.mxu0 %v2001_v8  ;;  %2026 = vmatpush3.bf16.msk.msra.mxu1 %vm3374_vm15, %v3371_v59 }
  0xfb   : > { %2028 = vmatprep.subr.msk.bf16.mxu1 %vm3376_vm2, %v3371_v59 }
  0xfd   : > { %1212 = vmatmul.mubr.f32.vlgmr.msra.gmra.mrb[4].mxu0 %v2911_v53 }
  0xfe   : > { %2030 = vmatpush3.bf16.msk.msra.mxu1 %vm3379_vm7, %v3371_v59 }
  0xff   : > { %2032 = vmatprep.subr.msk.bf16.mxu1 %vm2875_vm6, %v3371_v59 }
 0x102   : > { %2034 = vmatpush3.bf16.msk.msra.mxu1 %vm2893_vm12, %v3371_v59  ;;  %v1327_v59 = vld [vmem:[%s2517_s2] sm:$0xf] }
 0x105   : > { %1316 = vmatmul.mubr.f32.vlgmr.msra.gmra.mrb[4].mxu1 %v2911_v53 }
 0x190   : > { %v1665_v41 = vpop.f32.mrb[0].mxu0 }
 0x191   : > { %v1666_v0 = vpop.f32.mrb[1].mxu0 }
 0x192   : > { %v1667_v47 = vadd.f32 %v1666_v0, %v1665_v41 }
 0x198   : > { %v1700_v18 = vpop.f32.mrb[0].mxu1 }
 0x199   : > { %v1701_v56 = vpop.f32.mrb[1].mxu1 }
 0x19a   : > { %v1702_v42 = vadd.f32 %v1701_v56, %v1700_v18 }
 0x19c   : > { %v800_v12 = vadd.f32 %v1702_v42, %v1667_v47 }
 0x1b0   : > { %v1735_v57 = vpop.f32.mrb[2].mxu0 }
 0x1b1   : > { %v1736_v50 = vpop.f32.mrb[3].mxu0 }
 0x1b2   : > { %v1737_v25 = vadd.f32 %v1736_v50, %v1735_v57 }
 0x1b4   : > { %v938_v26 = vadd.f32 %v1737_v25, %v800_v12 }
 0x1b8   : > { %v1770_v62 = vpop.f32.mrb[2].mxu1 }
 0x1b9   : > { %v1771_v29 = vpop.f32.mrb[3].mxu1 }
 0x1ba   : > { %v1772_v35 = vadd.f32 %v1771_v29, %v1770_v62 }
 0x1bc   : > { %v1046_v19 = vadd.f32 %v1772_v35, %v938_v26 }
 0x1d0   : > { %v1805_v36 = vpop.f32.mrb[4].mxu0 }
 0x1d1   : > { %v1806_v53 = vpop.f32.mrb[5].mxu0 }
 0x1d2   : > { %v1807_v37 = vadd.f32 %v1806_v53, %v1805_v36 }
 0x1d4   : > { %v1214_v39 = vadd.f32 %v1807_v37, %v1046_v19 }
 0x1d8   : > { %v1840_v40 = vpop.f32.mrb[4].mxu1 }
 0x1d9   : > { %v1841_v15 = vpop.f32.mrb[5].mxu1 }
 0x1da   : > { %v1842_v45 = vadd.f32 %v1841_v15, %v1840_v40 }
 0x1dc   : > { %v1318_v1 = vadd.f32 %v1842_v45, %v1214_v39 }
 0x1de   : > { %v1321_v49 = vadd.f32 %v1318_v1, %v455_v46 }
 0x1e0   : > { %1322 = vst [vmem:[#allocation2] sm:$0xf] %v1321_v49 }
 0x1e7   : > { %v1328_v34 = vld [vmem:[#allocation2] sm:$0xf] }
 0x1e8   : > { %v1329_v51 = vsub.f32 %v1328_v34, %v1327_v59 }
 0x1ea   : > { %v1330_v44 = vand.u32 2147483647, %v1329_v51 }
 0x1ec   : > { %v1337_v2 = vmul.f32 %v1628_v24, %v1330_v44 }
 0x1ee   : > { %v1339_v6 = vsel %vm1338_vm4, %v1337_v2, 0.0 }
 0x1ef   : > { %v1340_v7 = vrot.slane %v1339_v6, 4 }
 0x1f1   : > { %v1341_v9 = vadd.f32 %v1340_v7, %v1339_v6 }
 0x1f3   : > { %v1342_v27 = vrot.slane %v1341_v9, 2 }
 0x1f5   : > { %v1343_v54 = vadd.f32 %v1342_v27, %v1341_v9 }
 0x1f7   : > { %v1344_v61 = vrot.slane %v1343_v54, 1 }
 0x1f9   : > { %v1345_v4 = vadd.f32 %v1344_v61, %v1343_v54 }
 0x1fb   : > { %1346 = vst [vmem:[%s307_s5] sm:$0x1] %v1345_v4 }
 0x1fc   : > { %2213 = shalt.err (!%p2210_p2)
}
 0x1fd   : > { %s2214_s25 = scalar_lea.hbm %s3187_s10, 16  ;;  %s2218_s27 = scalar_lea.hbm %s3240_s4, 32 }
 0x1fe   : > { %p2215_p11 = scmp.ne.s32.totalorder %s3187_s10, %s2214_s25  ;;  %p2219_p3 = scmp.lt.u32.totalorder %s3187_s10, %s3240_s4 }
 0x1ff   : > { %p2220_p4 = scmp.lt.u32.totalorder %s2218_s27, %s2214_s25  ;;  %p2222_p10 = scmp.lt.u32.totalorder %s2214_s25, %s3187_s10 }
 0x200   : > { %p2216_p5 = pnand %p2215_p11, %p3396_p12 }
 0x201   : > { %p2221_p0 = por %p2220_p4, %p2219_p3 }
 0x202   : > { %p2217_p7 = pneg %p2216_p5 }
 0x203   : > { %p2223_p1 = por %p2222_p10, %p2221_p0 }
 0x205   : > { %p2224_p8 = pnand %p2223_p1, %p2217_p7 }
 0x207   : > { %2227 = shalt.err (!%p2224_p8)
}
 0x208   : > { %2041 = dma.vmem_to_hbm [thread:$0]  (%p3396_p12), %s3189_s12, 16, %s3187_s10, %s1348_s6  }
 0x209 PF: > { %s1372_s14 = sand.u32 1, %s2266_s15   ;;  %p3397_p9 = scmp.ne.s32.totalorder %s3303_s30, 0 }
 0x20a   : > { %p3398_p6 = scmp.ge.s32.totalorder %s2286_s20, 2  ;;  %s1373_s9 = scalar_lea.sflag [#allocation5], %s1372_s14 }
 0x20c   : > { %p2054_p13 = pnand %p3398_p6, %p3397_p9 }
 0x20e   : > { %2261 = dma.done.wait (!%p2054_p13), %s1373_s9, 16  }
 0x20f   : > { %2263 = vsyncadd (!%p2054_p13), %s1373_s9, 4294967280  ;;  %s23_s20 = sadd.s32 1, %s2286_s20   ;;  %s3399_s28 = sld [smem:[#allocation13_spill]] }
 0x210   : > { %p20_p2 = scmp.ge.s32.totalorder %s23_s20, 4   ;;  %s3400_s15 = smov %s2270_s16 }
 0x211   : > { %s3401_s16 = smov %s2274_s17  ;;  %s3402_s17 = smov %s2379_s29 }
 0x212   : > { %s3403_s18 = smov %s2282_s19  ;;  %22 = sbr.rel (!%p20_p2) target bundleno = 10 (0xa), region = 116 }
 0x215   : > { %s3404_s19 = smov %s3399_s28 }
 0x219   :  { %1377 = vsyncpa [#allocation4], 1 }
 0x21a   :  { %1379 = vsyncpa [#allocation4 + $0x1], 1 }
 0x21b   :  { %1380 = vsyncpa [#allocation7], 1 }
 0x21c   :  { %1382 = vsyncpa [#allocation7 + $0x1], 1 }
 0x21d   :  { %1383 = vsyncpa [#allocation5], 1 }
 0x21e   :  { %1385 = vsyncpa [#allocation5 + $0x1], 1 }

</bundles_post_ra>
